<compile_context>
chip_gen: v6e
topology: v6e:2x2x1
jax: 0.10.0
libtpu: 0.0.40
codegen_flags: <defaults>
</compile_context>

<pallas_src>
import jax
import jax.numpy as jnp
from jax.experimental import pallas as pl
from jax.experimental.pallas import tpu as pltpu


def _round_up(v, m):
    return (v + m - 1) // m * m


def _pick_row_tile(batch):
    """Largest row tile that divides the batch and satisfies the 8-sublane rule."""
    for tb in (256, 128, 64, 32, 16, 8):
        if batch % tb == 0:
            return tb
    return batch  # small / odd batch: single full-extent row tile


def _pick_patch_tile(n_patches, row_tile, patch_dim, itemsize,
                     budget_bytes=4 << 20):
    """Largest multiple-of-8 divisor of N whose streamed patches tile fits a
    conservative per-buffer VMEM budget (2 pipeline buffers + the f32 widening
    temp still leave plenty of headroom under the 32 MiB scoped default)."""
    best = None
    tn = 8
    while tn <= n_patches:
        if (n_patches % tn == 0 and
                row_tile * tn * patch_dim * itemsize <= budget_bytes):
            best = tn
        tn += 8
    if best is None:
        best = n_patches  # tiny / odd N: one full-extent chunk
    return best


def _make_kernel(n_patches, compute_dtype, out_dtype):
    inv_n = 1.0 / float(n_patches)

    def kernel(patches_ref, w_embed_ref, b_embed_ref, w_probe_ref, b_probe_ref,
               out_ref, pooled_acc):
        n = pl.program_id(1)

        @pl.when(n == 0)
        def _init():
            pooled_acc[...] = jnp.zeros_like(pooled_acc)

        # Stream this chunk of patches and accumulate the per-image sum (f32).
        chunk = patches_ref[...].astype(jnp.float32)        # [TB, TN, PD]
        pooled_acc[...] += chunk.sum(axis=1)                # [TB, PD]

        @pl.when(n == pl.num_programs(1) - 1)
        def _finalize():
            # Mean pool (hoisted ahead of the linear patch embedding).
            pooled = (pooled_acc[...] * inv_n).astype(compute_dtype)
            # Patch embedding on pooled features: [TB, PD] @ [PD, Dp].
            feats = jnp.dot(pooled, w_embed_ref[...],
                            preferred_element_type=jnp.float32)
            feats = (feats + b_embed_ref[...]).astype(compute_dtype)
            # Linear probe: [TB, Dp] @ [Dp, Kp], lane-dense output store.
            logits = jnp.dot(feats, w_probe_ref[...],
                             preferred_element_type=jnp.float32)
            logits = logits + b_probe_ref[...]
            out_ref[...] = logits.astype(out_dtype)

    return kernel


def clip_classifier_forward(x, w_embed, b_embed, w_probe, b_probe, patch, *,
                            compute_dtype=jnp.bfloat16,
                            row_tile=None, patch_tile=None):
    """x: [B, C, H, W] float32 (NCHW).  Returns logits [B, K] float32."""
    B, C, H, W = x.shape
    P = patch
    assert H % P == 0 and W % P == 0
    N = (H // P) * (W // P)
    patch_dim = C * P * P
    D = w_embed.shape[1]
    K = w_probe.shape[0]

    # Lane-pad only the weight output dims (cheap, VMEM-resident); the streamed
    # patches keep their natural width so HBM traffic stays at the minimum.
    Dp = _round_up(D, 128)
    Kp = _round_up(K, 128)

    itemsize = jnp.dtype(compute_dtype).itemsize

    TB = row_tile if row_tile is not None else _pick_row_tile(B)
    assert B % TB == 0 and (TB % 8 == 0 or TB == B)
    TN = (patch_tile if patch_tile is not None
          else _pick_patch_tile(N, TB, patch_dim, itemsize))
    assert N % TN == 0 and (TN % 8 == 0 or TN == N)

    # ---- layout plumbing: unfold NCHW -> [B, N, patch_dim], cast to bf16 ----
    patches = x.reshape(B, C, H // P, P, W // P, P)
    patches = patches.transpose(0, 2, 4, 1, 3, 5).reshape(B, N, patch_dim)
    patches = patches.astype(compute_dtype)

    w_embed_p = jnp.pad(w_embed, ((0, 0), (0, Dp - D))).astype(compute_dtype)
    b_embed_p = jnp.pad(b_embed, (0, Dp - D)).reshape(1, Dp).astype(jnp.float32)
    w_probe_p = jnp.pad(w_probe.T, ((0, Dp - D), (0, Kp - K))).astype(compute_dtype)
    b_probe_p = jnp.pad(b_probe, (0, Kp - K)).reshape(1, Kp).astype(jnp.float32)

    grid = (B // TB, N // TN)

    cost = pl.CostEstimate(
        flops=B * N * patch_dim + 2 * B * patch_dim * D + 2 * B * D * K,
        transcendentals=0,
        bytes_accessed=(patches.size * itemsize
                        + w_embed_p.size * itemsize
                        + w_probe_p.size * itemsize
                        + (b_embed_p.size + b_probe_p.size) * 4
                        + B * Kp * 4),
    )

    out_padded = pl.pallas_call(
        _make_kernel(N, compute_dtype, jnp.float32),
        out_shape=jax.ShapeDtypeStruct((B, Kp), jnp.float32),
        grid_spec=pltpu.PrefetchScalarGridSpec(
            num_scalar_prefetch=0,
            grid=grid,
            in_specs=[
                # streamed operand: one patch chunk per grid step
                # (last block dim == full array dim, so no 128-padding needed)
                pl.BlockSpec((TB, TN, patch_dim), lambda b, n: (b, n, 0)),
                # resident operands: constant index_map -> fetched once
                pl.BlockSpec((patch_dim, Dp), lambda b, n: (0, 0)),
                pl.BlockSpec((1, Dp), lambda b, n: (0, 0)),
                pl.BlockSpec((Dp, Kp), lambda b, n: (0, 0)),
                pl.BlockSpec((1, Kp), lambda b, n: (0, 0)),
            ],
            out_specs=pl.BlockSpec((TB, Kp), lambda b, n: (b, 0)),
            scratch_shapes=[pltpu.VMEM((TB, patch_dim), jnp.float32)],
        ),
        compiler_params=pltpu.CompilerParams(
            dimension_semantics=("parallel", "arbitrary")),
        cost_estimate=cost,
    )(patches, w_embed_p, b_embed_p, w_probe_p, b_probe_p)

    return out_padded[:, :K]


def _reference_forward(x, w_embed, b_embed, w_probe, b_probe, patch):
    B, C, H, W = x.shape
    P = patch
    N = (H // P) * (W // P)
    patches = x.reshape(B, C, H // P, P, W // P, P)
    patches = patches.transpose(0, 2, 4, 1, 3, 5).reshape(B * N, C * P * P)
    feats = patches @ w_embed + b_embed[None, :]
    feats = feats.reshape(B, N, -1).mean(axis=1)
    return feats @ w_probe.T + b_probe[None, :]


if __name__ == "__main__":
    key = jax.random.PRNGKey(0)
    k_x, k_we, k_be, k_wp, k_bp = jax.random.split(key, 5)

    # Small shapes consistent with the module's forward.
    B, C, H, W = 2, 4, 16, 16          # NCHW input
    P = 4                               # patch size -> N = 16 patches
    D = 32                              # encoder feature dim
    K = 10                              # number of classes
    patch_dim = C * P * P

    x = jax.random.normal(k_x, (B, C, H, W), dtype=jnp.float32)
    w_embed = jax.random.normal(k_we, (patch_dim, D), dtype=jnp.float32) * 0.02
    b_embed = jax.random.normal(k_be, (D,), dtype=jnp.float32) * 0.02
    w_probe = jax.random.normal(k_wp, (K, D), dtype=jnp.float32) * 0.02
    b_probe = jax.random.normal(k_bp, (K,), dtype=jnp.float32) * 0.02

    # patch_tile=8 -> 2 reduction steps, exercising the pl.when init/finalize
    # accumulator path even at this tiny test size.
    logits = clip_classifier_forward(x, w_embed, b_embed, w_probe, b_probe, P,
                                     patch_tile=8)
    logits = jax.block_until_ready(logits)

    ref = _reference_forward(x, w_embed, b_embed, w_probe, b_probe, P)
    assert logits.shape == (B, K)
    # bf16 inputs with f32 accumulation -> compare to the f32 reference with a
    # bf16-appropriate tolerance (expected error ~1e-4 at these magnitudes).
    assert jnp.allclose(logits, ref, atol=1e-3, rtol=5e-2), \
        float(jnp.max(jnp.abs(logits - ref)))

    print("KERNEL_OK")
</pallas_src>

<mosaic_0001>
module attributes {stable_mosaic.version = 11 : i64} {
  func.func @kernel(%arg0: i32, %arg1: i32, %arg2: memref<2x8x64xbf16, #tpu.memory_space<vmem>>, %arg3: memref<64x128xbf16, #tpu.memory_space<vmem>>, %arg4: memref<1x128xf32, #tpu.memory_space<vmem>>, %arg5: memref<128x128xbf16, #tpu.memory_space<vmem>>, %arg6: memref<1x128xf32, #tpu.memory_space<vmem>>, %arg7: memref<2x128xf32, #tpu.memory_space<vmem>>, %arg8: memref<2x64xf32, #tpu.memory_space<vmem>>) attributes {dimension_semantics = [#tpu.dimension_semantics<parallel>, #tpu.dimension_semantics<arbitrary>], iteration_bounds = array<i64: 1, 2>, scalar_prefetch = 0 : i64, scratch_operands = 1 : i64, tpu.core_type = #tpu.core_type<tc>, window_params = [{transform_indices = @transform_0, window_bounds = array<i64: 2, 8, 64>}, {pipeline_mode = #tpu.pipeline_mode<synchronous>, transform_indices = @transform_1, window_bounds = array<i64: 64, 128>}, {pipeline_mode = #tpu.pipeline_mode<synchronous>, transform_indices = @transform_2, window_bounds = array<i64: 1, 128>}, {pipeline_mode = #tpu.pipeline_mode<synchronous>, transform_indices = @transform_3, window_bounds = array<i64: 128, 128>}, {pipeline_mode = #tpu.pipeline_mode<synchronous>, transform_indices = @transform_4, window_bounds = array<i64: 1, 128>}, {transform_indices = @transform_5, window_bounds = array<i64: 2, 128>}]} {
    %c0_i32 = arith.constant 0 : i32
    %0 = arith.cmpi eq, %arg1, %c0_i32 : i32
    %1 = arith.extui %0 : i1 to i32
    %c0_i32_0 = arith.constant 0 : i32
    %2 = arith.cmpi ne, %1, %c0_i32_0 : i32
    scf.if %2 {
      %cst_8 = arith.constant 0.000000e+00 : f32
      %12 = vector.broadcast %cst_8 : f32 to vector<2x64xf32>
      %c0_9 = arith.constant 0 : index
      %c0_10 = arith.constant 0 : index
      %13 = vector.load %arg8[%c0_9, %c0_10] : memref<2x64xf32, #tpu.memory_space<vmem>>, vector<2x64xf32>
      tpu.vector_store %arg8[%c0_9, %c0_10], %12 {strides = array<i32>} : memref<2x64xf32, #tpu.memory_space<vmem>>, vector<2x64xf32>,
    } else {
    }
    %c0 = arith.constant 0 : index
    %c0_1 = arith.constant 0 : index
    %c0_2 = arith.constant 0 : index
    %3 = vector.load %arg2[%c0, %c0_1, %c0_2] : memref<2x8x64xbf16, #tpu.memory_space<vmem>>, vector<2x8x64xbf16>
    %4 = arith.extf %3 : vector<2x8x64xbf16> to vector<2x8x64xf32>
    %c0_3 = arith.constant 0 : index
    %c0_4 = arith.constant 0 : index
    %5 = vector.load %arg8[%c0_3, %c0_4] : memref<2x64xf32, #tpu.memory_space<vmem>>, vector<2x64xf32>
    %cst = arith.constant dense<0.000000e+00> : vector<2x64xf32>
    %6 = vector.multi_reduction <add>, %4, %cst [1] : vector<2x8x64xf32> to vector<2x64xf32>
    %7 = arith.addf %5, %6 : vector<2x64xf32>
    %c0_5 = arith.constant 0 : index
    %c0_6 = arith.constant 0 : index
    %8 = vector.load %arg8[%c0_5, %c0_6] : memref<2x64xf32, #tpu.memory_space<vmem>>, vector<2x64xf32>
    tpu.vector_store %arg8[%c0_5, %c0_6], %7 {strides = array<i32>} : memref<2x64xf32, #tpu.memory_space<vmem>>, vector<2x64xf32>,
    %c1_i32 = arith.constant 1 : i32
    %9 = arith.cmpi eq, %arg1, %c1_i32 : i32
    %10 = arith.extui %9 : i1 to i32
    %c0_i32_7 = arith.constant 0 : i32
    %11 = arith.cmpi ne, %10, %c0_i32_7 : i32
    scf.if %11 {
      %c0_8 = arith.constant 0 : index
      %c0_9 = arith.constant 0 : index
      %12 = vector.load %arg8[%c0_8, %c0_9] : memref<2x64xf32, #tpu.memory_space<vmem>>, vector<2x64xf32>
      %cst_10 = arith.constant 6.250000e-02 : f32
      %13 = vector.broadcast %cst_10 : f32 to vector<2x64xf32>
      %14 = arith.mulf %12, %13 : vector<2x64xf32>
      %15 = arith.truncf %14 : vector<2x64xf32> to vector<2x64xbf16>
      %c0_11 = arith.constant 0 : index
      %c0_12 = arith.constant 0 : index
      %16 = vector.load %arg3[%c0_11, %c0_12] : memref<64x128xbf16, #tpu.memory_space<vmem>>, vector<64x128xbf16>
      %cst_13 = arith.constant dense<0.000000e+00> : vector<2x128xf32>
      %17 = tpu.matmul %15, %16, %cst_13 {dimension_numbers = #tpu.dot_dimension_numbers<[1], [0], [0], [1], [0, 0, 1, 1], [], []>} : vector<2x64xbf16>, vector<64x128xbf16>, vector<2x128xf32> -> vector<2x128xf32>
      %c0_14 = arith.constant 0 : index
      %c0_15 = arith.constant 0 : index
      %18 = vector.load %arg4[%c0_14, %c0_15] : memref<1x128xf32, #tpu.memory_space<vmem>>, vector<1x128xf32>
      %19 = vector.broadcast %18 : vector<1x128xf32> to vector<2x128xf32>
      %20 = arith.addf %17, %19 : vector<2x128xf32>
      %21 = arith.truncf %20 : vector<2x128xf32> to vector<2x128xbf16>
      %c0_16 = arith.constant 0 : index
      %c0_17 = arith.constant 0 : index
      %22 = vector.load %arg5[%c0_16, %c0_17] : memref<128x128xbf16, #tpu.memory_space<vmem>>, vector<128x128xbf16>
      %cst_18 = arith.constant dense<0.000000e+00> : vector<2x128xf32>
      %23 = tpu.matmul %21, %22, %cst_18 {dimension_numbers = #tpu.dot_dimension_numbers<[1], [0], [0], [1], [0, 0, 1, 1], [], []>} : vector<2x128xbf16>, vector<128x128xbf16>, vector<2x128xf32> -> vector<2x128xf32>
      %c0_19 = arith.constant 0 : index
      %c0_20 = arith.constant 0 : index
      %24 = vector.load %arg6[%c0_19, %c0_20] : memref<1x128xf32, #tpu.memory_space<vmem>>, vector<1x128xf32>
      %25 = vector.broadcast %24 : vector<1x128xf32> to vector<2x128xf32>
      %26 = arith.addf %23, %25 : vector<2x128xf32>
      %c0_21 = arith.constant 0 : index
      %c0_22 = arith.constant 0 : index
      %27 = vector.load %arg7[%c0_21, %c0_22] : memref<2x128xf32, #tpu.memory_space<vmem>>, vector<2x128xf32>
      tpu.vector_store %arg7[%c0_21, %c0_22], %26 {strides = array<i32>} : memref<2x128xf32, #tpu.memory_space<vmem>>, vector<2x128xf32>,
    } else {
    }
    return
  }
  func.func @transform_0(%arg0: i32, %arg1: i32) -> (i32, i32, i32) {
    %c0_i32 = arith.constant 0 : i32
    %c0_i32_0 = arith.constant 0 : i32
    return %arg0, %arg1, %c0_i32 : i32, i32, i32
  }
  func.func @transform_1(%arg0: i32, %arg1: i32) -> (i32, i32) {
    %c0_i32 = arith.constant 0 : i32
    %c0_i32_0 = arith.constant 0 : i32
    %c0_i32_1 = arith.constant 0 : i32
    return %c0_i32, %c0_i32_0 : i32, i32
  }
  func.func @transform_2(%arg0: i32, %arg1: i32) -> (i32, i32) {
    %c0_i32 = arith.constant 0 : i32
    %c0_i32_0 = arith.constant 0 : i32
    %c0_i32_1 = arith.constant 0 : i32
    return %c0_i32, %c0_i32_0 : i32, i32
  }
  func.func @transform_3(%arg0: i32, %arg1: i32) -> (i32, i32) {
    %c0_i32 = arith.constant 0 : i32
    %c0_i32_0 = arith.constant 0 : i32
    %c0_i32_1 = arith.constant 0 : i32
    return %c0_i32, %c0_i32_0 : i32, i32
  }
  func.func @transform_4(%arg0: i32, %arg1: i32) -> (i32, i32) {
    %c0_i32 = arith.constant 0 : i32
    %c0_i32_0 = arith.constant 0 : i32
    %c0_i32_1 = arith.constant 0 : i32
    return %c0_i32, %c0_i32_0 : i32, i32
  }
  func.func @transform_5(%arg0: i32, %arg1: i32) -> (i32, i32) {
    %c0_i32 = arith.constant 0 : i32
    %c0_i32_0 = arith.constant 0 : i32
    return %arg0, %c0_i32 : i32, i32
  }
}

</mosaic_0001>

<bundles_post_ra>
// kernel: tpu_custom_call.1
= control target key start
LH: loop header
LB: loop body
LE: loop exit
PB: predicated region body
PF: predicated region fallthrough
CT: control target
= control target key end

     0   :  { %s1162_s0 = inlined_call_operand.hbm [shape: bf16[2,16,64], index: 0, kind: input, shape index: {}]   ;;  %s1163_s1 = inlined_call_operand.hbm [shape: bf16[64,128], index: 1, kind: input, shape index: {}]   ;;  %s1164_s2 = inlined_call_operand.vmem [shape: f32[1,128], index: 2, kind: input, shape index: {}]   ;;  %s1165_s3 = inlined_call_operand.hbm [shape: bf16[128,128], index: 3, kind: input, shape index: {}]   ;;  %s1166_s4 = inlined_call_operand.vmem [shape: f32[1,128], index: 4, kind: input, shape index: {}]   ;;  %s1167_s5 = inlined_call_operand.hbm [shape: f32[2,128], index: 5, kind: output, shape index: {}]  }
   0x1   :  { %1173 = sst [smem:[#allocation13_spill]] %s1163_s1 }
   0x2   :  { %10 = vsyncpa [#allocation4], 0 }
   0x3   :  { %12 = vsyncpa [#allocation4 + $0x1], 0 }
   0x4   :  { %13 = vsyncpa [#allocation7], 0 }
   0x5   :  { %14 = vsyncpa [#allocation5], 0  ;;  %s997_s18 = smov 0   ;;  %s999_s19 = smov 0  }
   0x6   :  { %s1001_s20 = smov 0   ;;  %s1003_s21 = smov 0  }
   0x7   :  { %s1005_s22 = smov 0   ;;  %s1007_s23 = smov 0  }
   0x8 LB: > { %s1170_s24 = sadd.s32 4294967295, %s955_s23   ;;  %p48_p0 = scmp.ne.s32.totalorder %s943_s20, %s939_s19  ;;  %s955_s23 = sphi %s1007_s23, %s20_s23   ;;  %s951_s22 = sphi %s1005_s22, %s1189_s22   ;;  %s947_s21 = sphi %s1003_s21, %s1188_s21   ;;  %s943_s20 = sphi %s1001_s20, %s1187_s20   ;;  %s939_s19 = sphi %s999_s19, %s1186_s19   ;;  %s935_s18 = sphi %s997_s18, %s1185_s18  }
   0x9   : > { %p49_p1 = scmp.eq.s32.totalorder %s955_s23, 0  ;;  %p54_p2 = scmp.ne.s32.totalorder %s939_s19, %s935_s18 }
   0xa   : > { %p1032_p3 = scmp.eq.s32.totalorder %s1170_s24, 0  ;;  %p611_p4 = scmp.ge.s32.totalorder %s955_s23, 1 }
   0xb   : > { %p50_p5 = por %p49_p1, %p48_p0  ;;  %p175_p6 = scmp.lt.s32.totalorder %s955_s23, 3 }
   0xc   : > { %s1174_s25 = scalar_select %p1032_p3, 1, 0 }
   0xd   : > { %p1040_p7 = por %p1032_p3, %p54_p2  ;;  %p1044_p8 = pnand %p611_p4, %p175_p6 }
   0xe   : > { %s957_s28 = smov [#allocation6]   ;;  %p719_p11 = scmp.lt.s32.totalorder %s955_s23, 2 }
   0xf   : > { %s187_s29 = sshll.u32 %s957_s28, 4  ;;  %p706_p9 = pneg %p1044_p8  ;;  %s188_s29 = int_to_ptr.vmem [resolvable:$true] %s187_s29 }
  0x10   : > { %p1057_p12 = pnand %p719_p11, %p50_p5  ;;  %s804_s7 = scalar_lea.vmem %s188_s29, 512 }
  0x11   : > { %p1052_p10 = pnand %p706_p9, %p1032_p3  ;;  %p805_p0 = scmp.ne.s32.totalorder %s188_s29, %s804_s7 }
  0x12   : > { %p812_p4 = scmp.lt.s32.totalorder %s188_s29, %s188_s29  ;;  %p813_p6 = scmp.lt.s32.totalorder %s804_s7, %s804_s7 }
  0x13   : > { %p795_p13 = pneg %p1052_p10 }
  0x14   : > { %p814_p9 = por %p813_p6, %p812_p4 }
  0x15   : > { %p807_p1 = pnand %p805_p0, %p795_p13 }
  0x17   : > { %p808_p2 = pneg %p807_p1 }
  0x19   : > { %p815_p3 = pnand %p814_p9, %p808_p2 }
  0x1b   : > { %818 = shalt.err (!%p815_p3)
}
  0x1c   : > { %s1171_s8 = smov 64   ;;  %s1172_s9 = smov 4  }
  0x1d   : > { %s1179_s1 = sld [smem:[#allocation13_spill]]  ;;  %s960_s12 = smov [#allocation8]  }
  0x1e   : > { %s203_s13 = sshll.u32 %s960_s12, 4  ;;  %s204_s13 = int_to_ptr.vmem [resolvable:$true] %s203_s13 }
  0x1f   : > { %s830_s14 = scalar_lea.vmem %s204_s13, 1024  ;;  %p838_p0 = scmp.lt.s32.totalorder %s204_s13, %s204_s13 }
  0x20   : > { %p831_p5 = scmp.ne.s32.totalorder %s204_s13, %s830_s14  ;;  %p839_p1 = scmp.lt.s32.totalorder %s830_s14, %s830_s14 }
  0x22   : > { %p833_p3 = pnand %p831_p5, %p795_p13  ;;  %p840_p2 = por %p839_p1, %p838_p0 }
  0x23   : > { %709 = dma.hbm_to_vmem [thread:$0]  (!%p1052_p10), %s1179_s1, 512, %s188_s29, [#allocation7], %s1171_s8, %s1171_s8, %s1172_s9  }
  0x24   : > { %p834_p11 = pneg %p833_p3 }
  0x26   : > { %p841_p4 = pnand %p840_p2, %p834_p11 }
  0x28   : > { %844 = shalt.err (!%p841_p4)
}
  0x29   : > { %712 = dma.hbm_to_vmem [thread:$0]  (!%p1052_p10), %s1165_s3, 1024, %s204_s13, [#allocation7], %s1171_s8, %s1171_s8, %s1172_s9  }
  0x2a   : > { %s29_s17 = sadd.s32 1, %s951_s22  ;;  %s41_s18 = sadd.s32 1, %s943_s20 }
  0x2b   : > { %p30_p13 = scmp.ge.s32.totalorder %s29_s17, 2  ;;  %s220_s28 = sand.u32 1, %s943_s20  }
  0x2c   : > { %s615_s29 = sshll.u32 %s220_s28, 3  ;;  %s616_s30 = sshll.u32 %s951_s22, 6 }
  0x2d   : > { %s1191_s17 = smov (%p30_p13, %s29_s17), 0  ;;  %s232_s12 = scalar_lea.hbm %s1162_s0, %s616_s30 }
  0x2e   : > { %s37_s7 = ssub.s32 %s951_s22, %s1191_s17  ;;  %s224_s14 = scalar_lea.vmem [#allocation3], %s615_s29 }
  0x2f   : > { %p39_p6 = scmp.eq.s32.totalorder %s37_s7, 0  ;;  %s233_s15 = sshll.u32 %s224_s14, 4  ;;  %s234_s15 = int_to_ptr.vmem [resolvable:$true] %s233_s15 }
  0x30   : > { %s221_s16 = scalar_lea.sflag [#allocation4], %s220_s28  ;;  %p847_p10 = pneg %p1057_p12 }
  0x31   : > { %s1097_s13 = scalar_select %p39_p6, %s943_s20, %s41_s18  }
  0x32   : > { %s858_s24 = scalar_lea.vmem %s234_s15, 128  ;;  %s961_s8 = smov [#allocation3]  }
  0x33   : > { %p859_p9 = scmp.ne.s32.totalorder %s234_s15, %s858_s24  ;;  %s863_s9 = sshll.u32 %s961_s8, 4  ;;  %s864_s9 = int_to_ptr.vmem [resolvable:$false] %s863_s9 }
  0x34   : > { %s865_s1 = scalar_lea.vmem %s864_s9, 256  ;;  %p866_p11 = scmp.lt.s32.totalorder %s234_s15, %s864_s9 }
  0x35   : > { %p861_p5 = pnand %p859_p9, %p847_p10  ;;  %p867_p0 = scmp.lt.s32.totalorder %s865_s1, %s858_s24 }
  0x37   : > { %p862_p3 = pneg %p861_p5  ;;  %p868_p1 = por %p867_p0, %p866_p11 }
  0x39   : > { %p869_p2 = pnand %p868_p1, %p862_p3 }
  0x3b   : > { %872 = shalt.err (!%p869_p2)
}
  0x3c   : > { %s962_s29 = smov 128   ;;  %s1180_s18 = smov 4  }
  0x3d   : > { %s1181_s28 = smov 64   ;;  %245 = sbr.rel (%p1044_p8) target bundleno = 527 (0x20f), region = 40 }
  0x3e   : > { %716 = dma.hbm_to_vmem [thread:$0]  (!%p1057_p12), %s232_s12, 128, %s234_s15, %s221_s16, %s962_s29, %s1181_s28, %s1180_s18  }
  0x3f   : > { %s247_s30 = sand.u32 (!%p1044_p8), 1, %s939_s19  }
  0x40   : > { %s618_s8 = sshll.u32 (!%p1044_p8), %s247_s30, 3  ;;  %s248_s7 = scalar_lea.sflag (!%p1044_p8), [#allocation4], %s247_s30 }
  0x41   : > { %s251_s10 = scalar_lea.vmem (!%p1044_p8), [#allocation3], %s618_s8 }
  0x42   : > { %922 = dma.done.wait (%p1040_p7), %s248_s7, 128  }
  0x43   : > { %924 = vsyncadd (%p1040_p7), %s248_s7, 4294967168  ;;  %p1182_p4 = scmp.ne.s32.totalorder %s1174_s25, 0 }
  0x45   : > { %926 = dma.done.wait (%p1182_p4), [#allocation7], 1536  }
  0x46   : > { %928 = vsyncadd (%p1182_p4), [#allocation7], 4294965760  ;;  %p621_p12 = scmp.ne.s32.totalorder %s947_s21, 0 }
  0x48   : > { %286 = sbr.rel (%p621_p12) target bundleno = 79 (0x4f), region = 56 }
  0x4d   : > { %vm287_vm0 = vcmask 517120   ;;  %v963_v0 = vmov 0.0  }
  0x4e   : > { %288 = vst.msk [vmem:[#allocation2] sm:$0x3] %vm287_vm0, %v963_v0 }
  0x4f PF: > { %v643_v1 = vld [vmem:[%s251_s10] sm:$0xff]   ;;  %vm294_vm1 = vcmask 523264   ;;  %vm311_vm2 = vcmask 1041409   ;;  %vm315_vm3 = vcmask 517120   ;;  %p622_p7 = scmp.ne.s32.totalorder %s947_s21, 1 }
  0x50   : > { %v644_v2 = vunpack.c.l.bf16 %v643_v1  ;;  %v645_v3 = vunpack.c.h.bf16 %v643_v1 }
  0x52   : > { %v295_v4 = vsel %vm294_vm1, %v644_v2, 0.0  ;;  %v302_v5 = vsel %vm294_vm1, %v645_v3, 0.0 }
  0x53   : > { %v296_v6 = vrot.slane %v295_v4, 4  ;;  %v303_v7 = vrot.slane %v302_v5, 4 }
  0x55   : > { %v297_v8 = vadd.f32 %v296_v6, %v295_v4  ;;  %v304_v9 = vadd.f32 %v303_v7, %v302_v5  ;;  %v293_v16 = vld [vmem:[#allocation2] sm:$0x3] }
  0x57   : > { %v298_v10 = vrot.slane %v297_v8, 2  ;;  %v305_v11 = vrot.slane %v304_v9, 2 }
  0x59   : > { %v299_v12 = vadd.f32 %v298_v10, %v297_v8  ;;  %v306_v13 = vadd.f32 %v305_v11, %v304_v9 }
  0x5b   : > { %v300_v14 = vrot.slane %v299_v12, 1  ;;  %v307_v15 = vrot.slane %v306_v13, 1 }
  0x5d   : > { %v301_v17 = vadd.f32 %v300_v14, %v299_v12  ;;  %v308_v18 = vadd.f32 %v307_v15, %v306_v13 }
  0x5e   : > { %320 = sbr.rel (%p622_p7) target bundleno = 512 (0x200), region = 60 }
  0x5f   : > { %v312_v19 = vsel %vm311_vm2, %v308_v18, %v301_v17 }
  0x60   : > { %v314_v20 = vadd.f32 %v312_v19, %v293_v16 }
  0x62   : > { %316 = vst.msk [vmem:[#allocation2] sm:$0x3] %vm315_vm3, %v314_v20 }
  0x63   : > { %v781_v21 = vld [vmem:[#allocation6 + $0x18] sm:$0xff]   ;;  %v964_v22 = vmov 0.0   ;;  %v782_v23 = vld [vmem:[#allocation6 + $0x10] sm:$0xff]   ;;  %vm965_vm4 = vmmov 0   ;;  %v783_v24 = vld [vmem:[#allocation6 + $0x8] sm:$0xff]  }
  0x64   : > { %660 = vmatprep.subr.bf16.mxu0 %v964_v22  ;;  %672 = vmatprep.subr.bf16.mxu1 %v964_v22  ;;  %v785_v25 = vld [vmem:[#allocation8 + $0x38] sm:$0xff]   ;;  %v786_v27 = vld [vmem:[#allocation8 + $0x30] sm:$0xff]   ;;  %v784_v29 = vld [vmem:[#allocation6] sm:$0xff]  }
  0x65   : > { %661 = vmatpush3.bf16.msra.mxu0 %v781_v21  ;;  %668 = vmatprep.mubr.msk.bf16.mxu0 %vm965_vm4, %v964_v22  ;;  %v787_v30 = vld [vmem:[#allocation8 + $0x28] sm:$0xff]   ;;  %v788_v32 = vld [vmem:[#allocation8 + $0x20] sm:$0xff]   ;;  %v789_v33 = vld [vmem:[#allocation8 + $0x18] sm:$0xff]  }
  0x66   : > { %662 = vmatprep.subr.bf16.mxu0 %v964_v22  ;;  %688 = vmatprep.mubr.msk.bf16.mxu1 %vm965_vm4, %v964_v22  ;;  %v790_v34 = vld [vmem:[#allocation8 + $0x10] sm:$0xff]   ;;  %v791_v35 = vld [vmem:[#allocation8 + $0x8] sm:$0xff]   ;;  %v792_v36 = vld [vmem:[#allocation8] sm:$0xff]  }
  0x67   : > { %673 = vmatpush3.bf16.msra.mxu1 %v785_v25  ;;  %v623_v37 = vld [vmem:[%s1164_s2] ss:$0 sm:$0xff] }
  0x68   : > { %674 = vmatprep.subr.bf16.mxu1 %v964_v22  ;;  %v629_v44 = vld [vmem:[%s1166_s4] ss:$0 sm:$0xff] }
  0x69   : > { %663 = vmatpush3.bf16.msra.mxu0 %v782_v23  ;;  %v321_v26 = vld [vmem:[#allocation2] sm:$0x3] }
  0x6a   : > { %664 = vmatprep.subr.bf16.mxu0 %v964_v22  ;;  %v322_v28 = vmul.f32 0.0625, %v321_v26 }
  0x6b   : > { %675 = vmatpush3.bf16.msra.mxu1 %v786_v27 }
  0x6c   : > { %676 = vmatprep.subr.bf16.mxu1 %v964_v22  ;;  %v323_v31 = vpack.c.bf16 %v322_v28, %v322_v28 }
  0x6d   : > { %665 = vmatpush3.bf16.msra.mxu0 %v783_v24 }
  0x6e   : > { %666 = vmatprep.subr.bf16.mxu0 %v964_v22 }
  0x6f   : > { %677 = vmatpush3.bf16.msra.mxu1 %v787_v30 }
  0x70   : > { %678 = vmatprep.subr.bf16.mxu1 %v964_v22 }
  0x71   : > { %667 = vmatpush3.bf16.msra.mxu0 %v784_v29 }
  0x73   : > { %679 = vmatpush3.bf16.msra.mxu1 %v788_v32 }
  0x74   : > { %669 = vmatmul.mubr.msk.bf16.vlgmr.msra.gmra.mxu0 %vm294_vm1, %v323_v31  ;;  %680 = vmatprep.subr.bf16.mxu1 %v964_v22 }
  0x77   : > { %681 = vmatpush3.bf16.msra.mxu1 %v789_v33 }
  0x78   : > { %682 = vmatprep.subr.bf16.mxu1 %v964_v22 }
  0x7b   : > { %683 = vmatpush3.bf16.msra.mxu1 %v790_v34 }
  0x7c   : > { %684 = vmatprep.subr.bf16.mxu1 %v964_v22 }
  0x7f   : > { %685 = vmatpush3.bf16.msra.mxu1 %v791_v35 }
  0x80   : > { %686 = vmatprep.subr.bf16.mxu1 %v964_v22 }
  0x83   : > { %687 = vmatpush3.bf16.msra.mxu1 %v792_v36 }
 0x134   : > { %v400_v38 = vpop.f32.mrf.mxu0 }
 0x135   : > { %v401_v39 = vadd.f32 %v623_v37, %v400_v38 }
 0x136   : > { %v670_v40 = vpop.f32.mrf.mxu0 }
 0x137   : > { %v406_v41 = vpack.c.bf16 %v401_v39, %v401_v39 }
 0x138   : > { %v403_v42 = vpop.f32.mrf.mxu0 }
 0x139   : > { %689 = vmatmul.mubr.bf16.vlgmr.msra.gmra.mxu1 %v406_v41 }
 0x13a   : > { %v671_v43 = vpop.f32.mrf.mxu0 }
 0x1f9   : > { %v512_v45 = vpop.f32.mrf.mxu1 }
 0x1fa   : > { %v513_v46 = vadd.f32 %v629_v44, %v512_v45 }
 0x1fb   : > { %v690_v47 = vpop.f32.mrf.mxu1 }
 0x1fc   : > { %518 = vst [vmem:[#allocation9] sm:$0x3] %v513_v46 }
 0x1fd   : > { %v515_v48 = vpop.f32.mrf.mxu1 }
 0x1ff   : > { %v691_v49 = vpop.f32.mrf.mxu1 }
 0x200 PF: > { %s1183_s26 = sadd.s32 4294967295, %s955_s23   ;;  %s966_s6 = smov [#allocation9]  }
 0x201   : > { %p1129_p8 = scmp.eq.s32.totalorder %s1183_s26, 1  ;;  %s528_s9 = sshll.u32 %s966_s6, 4  ;;  %s529_s9 = int_to_ptr.vmem [resolvable:$true] %s528_s9 }
 0x202   : > { %s873_s11 = scalar_lea.vmem %s529_s9, 32  ;;  %p880_p9 = scmp.lt.s32.totalorder %s529_s9, %s529_s9 }
 0x203   : > { %p874_p13 = scmp.ne.s32.totalorder %s529_s9, %s873_s11  ;;  %p881_p5 = scmp.lt.s32.totalorder %s873_s11, %s873_s11 }
 0x205   : > { %p875_p6 = pnand %p874_p13, %p1129_p8  ;;  %p882_p3 = por %p881_p5, %p880_p9 }
 0x207   : > { %p876_p10 = pneg %p875_p6 }
 0x209   : > { %p883_p11 = pnand %p882_p3, %p876_p10 }
 0x20b   : > { %886 = shalt.err (!%p883_p11)
}
 0x20c   : > { %703 = dma.vmem_to_hbm [thread:$0]  (%p1129_p8), %s529_s9, 32, %s1167_s5, [#allocation5]  }
 0x20d   : > { %930 = dma.done.wait (%p1129_p8), [#allocation5], 32  }
 0x20e   : > { %932 = vsyncadd (%p1129_p8), [#allocation5], 4294967264 }
 0x20f PF: > { %s20_s23 = sadd.s32 1, %s955_s23   ;;  %s1185_s18 = smov %s939_s19 }
 0x210   : > { %p17_p0 = scmp.ge.s32.totalorder %s20_s23, 4   ;;  %s1186_s19 = smov %s943_s20 }
 0x211   : > { %s1187_s20 = smov %s1097_s13  ;;  %s1188_s21 = smov %s951_s22 }
 0x212   : > { %s1189_s22 = smov %s1191_s17  ;;  %19 = sbr.rel (!%p17_p0) target bundleno = 8 (0x8), region = 94 }
 0x217   :  { %541 = vsyncpa [#allocation4], 1 }
 0x218   :  { %543 = vsyncpa [#allocation4 + $0x1], 1 }
 0x219   :  { %544 = vsyncpa [#allocation7], 1 }
 0x21a   :  { %545 = vsyncpa [#allocation5], 1 }
 0x21b   :  { %547 = vsyncpa [#allocation5 + $0x1], 1 }

</bundles_post_ra>
